<compile_context>
chip_gen: v6e
topology: v6e:2x2x1
jax: 0.10.0
libtpu: 0.0.40
codegen_flags: <defaults>
</compile_context>

<pallas_src>
import functools
import math

import jax
import jax.numpy as jnp
from jax.experimental import pallas as pl
from jax.experimental.pallas import tpu as pltpu

# ---- synthetic "bert-base-uncased" config, scaled down for a small runnable demo ----
VOCAB      = 128
MAX_POS    = 32
TYPE_VOCAB = 2
HIDDEN     = 128          # stands in for 768
N_HEADS    = 4            # stands in for 12
HEAD_DIM   = HIDDEN // N_HEADS
INTER      = 256          # stands in for 3072
N_LAYERS   = 2            # stands in for 12
N_LABELS   = 13
LN_EPS     = 1e-12
LOGIT_PAD  = 128          # classifier output padded to one full lane width

ACT_DTYPE   = jnp.bfloat16            # activation storage dtype between kernels
_VMEM_LIMIT = 32 * 1024 * 1024        # safe on v5e/v6e (128 MiB) and v7x (64 MiB physical)


def _gelu(x):
    # TODO(synk): HF BERT uses erf-GELU; tanh approximation gives tiny numeric drift.
    c = jnp.float32(0.7978845608028654)  # sqrt(2/pi)
    return 0.5 * x * (1.0 + jnp.tanh(c * (x + 0.044715 * x * x * x)))


def _apply_act(x, activation):
    if activation == "gelu":
        return _gelu(x)
    if activation == "tanh":
        return jnp.tanh(x)
    return x


def _tile(dim, pref):
    """Largest tile <= pref that evenly divides dim; falls back to the full dim."""
    if dim <= pref:
        return dim
    t = pref
    while dim % t != 0 and t > 8:
        t //= 2
    return t if dim % t == 0 else dim


# --------------------------- LayerNorm (embeddings) ---------------------------

def _ln_math(x, g, b):
    x = x.astype(jnp.float32)
    mean = jnp.mean(x, axis=-1, keepdims=True)
    xc = x - mean
    var = jnp.mean(xc * xc, axis=-1, keepdims=True)
    return xc * jax.lax.rsqrt(var + LN_EPS) * g + b


def _layernorm_kernel(x_ref, g_ref, b_ref, o_ref):
    o_ref[...] = _ln_math(x_ref[...], g_ref[...], b_ref[...]).astype(o_ref.dtype)


def layernorm(x, g, b, tm=512):
    M, H = x.shape
    tm = _tile(M, tm)
    return pl.pallas_call(
        _layernorm_kernel,
        out_shape=jax.ShapeDtypeStruct((M, H), ACT_DTYPE),
        grid=(M // tm,),
        in_specs=[pl.BlockSpec((tm, H), lambda i: (i, 0)),
                  pl.BlockSpec((1, H), lambda i: (0, 0)),
                  pl.BlockSpec((1, H), lambda i: (0, 0))],
        out_specs=pl.BlockSpec((tm, H), lambda i: (i, 0)),
        compiler_params=pltpu.CompilerParams(
            dimension_semantics=("parallel",), vmem_limit_bytes=_VMEM_LIMIT),
    )(x, g.reshape(1, H), b.reshape(1, H))


# --------------------------- tiled matmul + bias (+ activation) ---------------------------

def _mm_kernel_1k(x_ref, w_ref, b_ref, o_ref, *, activation):
    # single contraction step: no accumulator scratch, direct store
    acc = jnp.dot(x_ref[...], w_ref[...], preferred_element_type=jnp.float32) + b_ref[...]
    o_ref[...] = _apply_act(acc, activation).astype(o_ref.dtype)


def _mm_kernel_nk(x_ref, w_ref, b_ref, o_ref, acc_ref, *, activation):
    @pl.when(pl.program_id(2) == 0)
    def _():
        acc_ref[...] = jnp.zeros_like(acc_ref)

    acc_ref[...] += jnp.dot(x_ref[...], w_ref[...], preferred_element_type=jnp.float32)

    @pl.when(pl.program_id(2) == pl.num_programs(2) - 1)
    def _():
        acc = acc_ref[...] + b_ref[...]
        o_ref[...] = _apply_act(acc, activation).astype(o_ref.dtype)


def linear(x, w, b, activation="none", out_dtype=ACT_DTYPE, tm=256, tn=256, tk=512):
    """x:(M,K) bf16, w:(K,N) bf16, b:(N,) f32 -> (M,N) out_dtype (bf16 by default)."""
    M, K = x.shape
    N = w.shape[1]
    tm, tn, tk = _tile(M, tm), _tile(N, tn), _tile(K, tk)
    nk = K // tk
    b2 = b.reshape(1, N)
    if nk == 1:
        return pl.pallas_call(
            functools.partial(_mm_kernel_1k, activation=activation),
            out_shape=jax.ShapeDtypeStruct((M, N), out_dtype),
            grid=(M // tm, N // tn),
            in_specs=[pl.BlockSpec((tm, K), lambda i, j: (i, 0)),
                      pl.BlockSpec((K, tn), lambda i, j: (0, j)),
                      pl.BlockSpec((1, tn), lambda i, j: (0, j))],
            out_specs=pl.BlockSpec((tm, tn), lambda i, j: (i, j)),
            compiler_params=pltpu.CompilerParams(
                dimension_semantics=("parallel", "parallel"),
                vmem_limit_bytes=_VMEM_LIMIT),
        )(x, w, b2)
    return pl.pallas_call(
        functools.partial(_mm_kernel_nk, activation=activation),
        out_shape=jax.ShapeDtypeStruct((M, N), out_dtype),
        grid=(M // tm, N // tn, nk),
        in_specs=[pl.BlockSpec((tm, tk), lambda i, j, k: (i, k)),
                  pl.BlockSpec((tk, tn), lambda i, j, k: (k, j)),
                  pl.BlockSpec((1, tn), lambda i, j, k: (0, j))],
        out_specs=pl.BlockSpec((tm, tn), lambda i, j, k: (i, j)),
        scratch_shapes=[pltpu.VMEM((tm, tn), jnp.float32)],
        compiler_params=pltpu.CompilerParams(
            dimension_semantics=("parallel", "parallel", "arbitrary"),
            vmem_limit_bytes=_VMEM_LIMIT),
    )(x, w, b2)


# ------------------- matmul + bias + residual-add + LayerNorm (fused epilogue) -------------------

def _mm_res_ln_kernel_1k(x_ref, w_ref, b_ref, res_ref, g_ref, beta_ref, o_ref):
    acc = jnp.dot(x_ref[...], w_ref[...], preferred_element_type=jnp.float32) + b_ref[...]
    y = res_ref[...].astype(jnp.float32) + acc
    o_ref[...] = _ln_math(y, g_ref[...], beta_ref[...]).astype(o_ref.dtype)


def _mm_res_ln_kernel_nk(x_ref, w_ref, b_ref, res_ref, g_ref, beta_ref, o_ref, acc_ref):
    @pl.when(pl.program_id(1) == 0)
    def _():
        acc_ref[...] = jnp.zeros_like(acc_ref)

    acc_ref[...] += jnp.dot(x_ref[...], w_ref[...], preferred_element_type=jnp.float32)

    @pl.when(pl.program_id(1) == pl.num_programs(1) - 1)
    def _():
        y = res_ref[...].astype(jnp.float32) + acc_ref[...] + b_ref[...]
        o_ref[...] = _ln_math(y, g_ref[...], beta_ref[...]).astype(o_ref.dtype)


def linear_residual_ln(x, w, b, res, g, beta, tm=256, tk=512):
    """LayerNorm(res + x @ w + b); LN over the full output width N (tn == N required)."""
    M, K = x.shape
    N = w.shape[1]
    tm, tk = _tile(M, tm), _tile(K, tk)
    nk = K // tk
    b2, g2, be2 = b.reshape(1, N), g.reshape(1, N), beta.reshape(1, N)
    if nk == 1:
        return pl.pallas_call(
            _mm_res_ln_kernel_1k,
            out_shape=jax.ShapeDtypeStruct((M, N), ACT_DTYPE),
            grid=(M // tm,),
            in_specs=[pl.BlockSpec((tm, K), lambda i: (i, 0)),
                      pl.BlockSpec((K, N), lambda i: (0, 0)),
                      pl.BlockSpec((1, N), lambda i: (0, 0)),
                      pl.BlockSpec((tm, N), lambda i: (i, 0)),
                      pl.BlockSpec((1, N), lambda i: (0, 0)),
                      pl.BlockSpec((1, N), lambda i: (0, 0))],
            out_specs=pl.BlockSpec((tm, N), lambda i: (i, 0)),
            compiler_params=pltpu.CompilerParams(
                dimension_semantics=("parallel",), vmem_limit_bytes=_VMEM_LIMIT),
        )(x, w, b2, res, g2, be2)
    return pl.pallas_call(
        _mm_res_ln_kernel_nk,
        out_shape=jax.ShapeDtypeStruct((M, N), ACT_DTYPE),
        grid=(M // tm, nk),
        in_specs=[pl.BlockSpec((tm, tk), lambda i, k: (i, k)),
                  pl.BlockSpec((tk, N), lambda i, k: (k, 0)),
                  pl.BlockSpec((1, N), lambda i, k: (0, 0)),
                  pl.BlockSpec((tm, N), lambda i, k: (i, 0)),
                  pl.BlockSpec((1, N), lambda i, k: (0, 0)),
                  pl.BlockSpec((1, N), lambda i, k: (0, 0))],
        out_specs=pl.BlockSpec((tm, N), lambda i, k: (i, 0)),
        scratch_shapes=[pltpu.VMEM((tm, N), jnp.float32)],
        compiler_params=pltpu.CompilerParams(
            dimension_semantics=("parallel", "arbitrary"),
            vmem_limit_bytes=_VMEM_LIMIT),
    )(x, w, b2, res, g2, be2)


# --------------------------- attention: QKV slab in, heads packed on lanes ---------------------------

def _attention_kernel(qkv_ref, bias_ref, o_ref, *, nh, dh, rb):
    H = nh * dh
    for r in range(rb):                      # static loop over batch rows in this block
        qkv = qkv_ref[r]                     # (S, 3H) bf16, lane-dense
        bias = bias_ref[r]                   # (1, S) f32 additive mask bias
        for h in range(nh):                  # heads = contiguous DH-wide column groups
            lo = h * dh
            qh = qkv[:, lo:lo + dh]                      # scale already folded into w_qkv
            kh = qkv[:, H + lo:H + lo + dh]
            vh = qkv[:, 2 * H + lo:2 * H + lo + dh]
            s = jnp.einsum('qd,kd->qk', qh, kh,
                           preferred_element_type=jnp.float32) + bias
            s = s - jnp.max(s, axis=-1, keepdims=True)
            p = jnp.exp(s)
            p = p * pl.reciprocal(jnp.sum(p, axis=-1, keepdims=True), approx=True)
            # static-slice store of the per-head context (no end-of-kernel concat)
            o_ref[r, :, lo:lo + dh] = jnp.dot(
                p.astype(jnp.bfloat16), vh,
                preferred_element_type=jnp.float32).astype(o_ref.dtype)


def attention(qkv, attn_bias):
    """qkv: (B, S, 3H) bf16 slab from the fused QKV projection; attn_bias: (B, 1, S) f32."""
    B, S, H3 = qkv.shape
    H = H3 // 3
    # batch several rows per grid step (amortize per-step overhead) while keeping >=2 steps
    rb = max(1, B // 2)
    while B % rb != 0:
        rb -= 1
    return pl.pallas_call(
        functools.partial(_attention_kernel, nh=N_HEADS, dh=HEAD_DIM, rb=rb),
        out_shape=jax.ShapeDtypeStruct((B, S, H), ACT_DTYPE),
        grid=(B // rb,),
        in_specs=[pl.BlockSpec((rb, S, H3), lambda b: (b, 0, 0)),
                  pl.BlockSpec((rb, 1, S), lambda b: (b, 0, 0))],
        out_specs=pl.BlockSpec((rb, S, H), lambda b: (b, 0, 0)),
        compiler_params=pltpu.CompilerParams(
            dimension_semantics=("parallel",), vmem_limit_bytes=_VMEM_LIMIT),
    )(qkv, attn_bias)


# --------------------------- fused pooler (tanh) + padded classifier ---------------------------

def _pool_cls_kernel(cls_ref, pw_ref, pb_ref, cw_ref, cb_ref, o_ref):
    pooled = jnp.tanh(jnp.dot(cls_ref[...], pw_ref[...],
                              preferred_element_type=jnp.float32) + pb_ref[...])
    # torch.nn.Dropout(0.3) on `pooled` is identity at inference (eval-mode semantics).
    logits = jnp.dot(pooled.astype(jnp.bfloat16), cw_ref[...],
                     preferred_element_type=jnp.float32) + cb_ref[...]
    o_ref[...] = logits


def pool_and_classify(cls, pw, pb, cw, cb):
    B, H = cls.shape
    P = cw.shape[1]
    return pl.pallas_call(
        _pool_cls_kernel,
        out_shape=jax.ShapeDtypeStruct((B, P), jnp.float32),
        grid=(1,),
        in_specs=[pl.BlockSpec((B, H), lambda i: (0, 0)),
                  pl.BlockSpec((H, H), lambda i: (0, 0)),
                  pl.BlockSpec((1, H), lambda i: (0, 0)),
                  pl.BlockSpec((H, P), lambda i: (0, 0)),
                  pl.BlockSpec((1, P), lambda i: (0, 0))],
        out_specs=pl.BlockSpec((B, P), lambda i: (0, 0)),
        compiler_params=pltpu.CompilerParams(
            dimension_semantics=("arbitrary",), vmem_limit_bytes=_VMEM_LIMIT),
    )(cls, pw, pb.reshape(1, H), cw, cb.reshape(1, P))


# --------------------------- model (glue) ---------------------------

def encoder_layer(x, attn_bias, p, B, S):
    H = HIDDEN
    # fused QKV projection: one launch, x read from HBM once; scale folded into Q weights
    qkv = linear(x, p["w_qkv"], p["b_qkv"])                          # (B*S, 3H) bf16
    # free reshape (contiguous) -> attention consumes the slab directly, no XLA slices
    ctx = attention(qkv.reshape(B, S, 3 * H), attn_bias).reshape(B * S, H)
    # output projection with residual-add + LayerNorm fused into the epilogue
    x = linear_residual_ln(ctx, p["wo"], p["bo"], x, p["ln1_g"], p["ln1_b"])
    inter = linear(x, p["wi"], p["bi"], activation="gelu")           # (B*S, INTER) bf16
    x = linear_residual_ln(inter, p["wo2"], p["bo2"], x, p["ln2_g"], p["ln2_b"])
    return x


def bert_class_forward(params, ids, mask, token_type_ids):
    B, S = ids.shape
    # embedding gathers left to XLA (data-dependent row gather)
    we = jnp.take(params["word_emb"], ids, axis=0)                   # (B, S, H)
    pe = params["pos_emb"][:S][None, :, :]                           # (1, S, H)
    te = jnp.take(params["type_emb"], token_type_ids, axis=0)        # (B, S, H)
    x = (we + pe + te).reshape(B * S, HIDDEN)
    x = layernorm(x, params["emb_ln_g"], params["emb_ln_b"])         # bf16 out

    # additive attention-mask bias, computed once (not per head / per grid step)
    attn_bias = (1.0 - mask.astype(jnp.float32)).reshape(B, 1, S) * (-10000.0)

    for lp in params["layers"]:
        x = encoder_layer(x, attn_bias, lp, B, S)

    cls = x.reshape(B, S, HIDDEN)[:, 0, :]                           # (B, H) pooled [CLS] input
    logits = pool_and_classify(cls, params["pool_w"], params["pool_b"],
                               params["cls_w"], params["cls_b"])[:, :N_LABELS]
    return logits


def init_params(key):
    std = 0.02
    scale = 1.0 / math.sqrt(HEAD_DIM)

    def nrm(k, shape):
        return std * jax.random.normal(k, shape, jnp.float32)

    keys = jax.random.split(key, 8 + N_LAYERS)
    cls_w = nrm(keys[4], (HIDDEN, N_LABELS))
    cls_w_pad = jnp.zeros((HIDDEN, LOGIT_PAD), jnp.float32).at[:, :N_LABELS].set(cls_w)
    params = {
        "word_emb": nrm(keys[0], (VOCAB, HIDDEN)),
        "pos_emb":  nrm(keys[1], (MAX_POS, HIDDEN)),
        "type_emb": nrm(keys[2], (TYPE_VOCAB, HIDDEN)),
        "emb_ln_g": jnp.ones((HIDDEN,), jnp.float32),
        "emb_ln_b": jnp.zeros((HIDDEN,), jnp.float32),
        "pool_w":   nrm(keys[3], (HIDDEN, HIDDEN)).astype(jnp.bfloat16),
        "pool_b":   jnp.zeros((HIDDEN,), jnp.float32),
        "cls_w":    cls_w_pad.astype(jnp.bfloat16),
        "cls_b":    jnp.zeros((LOGIT_PAD,), jnp.float32),
        "layers":   [],
    }
    for l in range(N_LAYERS):
        lk = jax.random.split(keys[8 + l], 4)
        w_qkv = nrm(lk[0], (HIDDEN, 3 * HIDDEN))
        # fold 1/sqrt(head_dim) into the Q projection (weight prep, zero runtime cost)
        w_qkv = w_qkv.at[:, :HIDDEN].multiply(scale)
        b_qkv = jnp.zeros((3 * HIDDEN,), jnp.float32)
        b_qkv = b_qkv.at[:HIDDEN].multiply(scale)   # (no-op on zeros, kept for generality)
        params["layers"].append({
            "w_qkv": w_qkv.astype(jnp.bfloat16),    # fused (H, 3H) bf16 in HBM
            "b_qkv": b_qkv,
            "wo":    nrm(lk[1], (HIDDEN, HIDDEN)).astype(jnp.bfloat16),
            "bo":    jnp.zeros((HIDDEN,), jnp.float32),
            "ln1_g": jnp.ones((HIDDEN,), jnp.float32),
            "ln1_b": jnp.zeros((HIDDEN,), jnp.float32),
            "wi":    nrm(lk[2], (HIDDEN, INTER)).astype(jnp.bfloat16),
            "bi":    jnp.zeros((INTER,), jnp.float32),
            "wo2":   nrm(lk[3], (INTER, HIDDEN)).astype(jnp.bfloat16),
            "bo2":   jnp.zeros((HIDDEN,), jnp.float32),
            "ln2_g": jnp.ones((HIDDEN,), jnp.float32),
            "ln2_b": jnp.zeros((HIDDEN,), jnp.float32),
        })
    return params


if __name__ == "__main__":
    key = jax.random.PRNGKey(0)
    pkey, ikey, tkey = jax.random.split(key, 3)
    B, S = 2, 8
    ids = jax.random.randint(ikey, (B, S), 0, VOCAB, dtype=jnp.int32)
    mask = jnp.ones((B, S), jnp.int32).at[:, S - 2:].set(0)     # last 2 positions padded
    token_type_ids = jax.random.randint(tkey, (B, S), 0, TYPE_VOCAB, dtype=jnp.int32)

    params = init_params(pkey)
    logits = bert_class_forward(params, ids, mask, token_type_ids)
    logits = jax.block_until_ready(logits)
    assert logits.shape == (B, N_LABELS) and logits.dtype == jnp.float32
    assert bool(jnp.all(jnp.isfinite(logits)))

    # BERTClass.predict equivalent (argmax over 13 classes), just to exercise it:
    predicted = jax.block_until_ready(jnp.argmax(logits, axis=1))
    assert predicted.shape == (B,)
    print("KERNEL_OK")
</pallas_src>

<mosaic_0001>
module attributes {stable_mosaic.version = 11 : i64} {
  func.func @_layernorm_kernel(%arg0: i32, %arg1: memref<16x128xf32, #tpu.memory_space<vmem>>, %arg2: memref<1x128xf32, #tpu.memory_space<vmem>>, %arg3: memref<1x128xf32, #tpu.memory_space<vmem>>, %arg4: memref<16x128xbf16, #tpu.memory_space<vmem>>) attributes {dimension_semantics = [#tpu.dimension_semantics<parallel>], iteration_bounds = array<i64: 1>, scalar_prefetch = 0 : i64, scratch_operands = 0 : i64, tpu.core_type = #tpu.core_type<tc>, window_params = [{transform_indices = @transform_0, window_bounds = array<i64: 16, 128>}, {pipeline_mode = #tpu.pipeline_mode<synchronous>, transform_indices = @transform_1, window_bounds = array<i64: 1, 128>}, {pipeline_mode = #tpu.pipeline_mode<synchronous>, transform_indices = @transform_2, window_bounds = array<i64: 1, 128>}, {transform_indices = @transform_3, window_bounds = array<i64: 16, 128>}]} {
    %c0 = arith.constant 0 : index
    %c0_0 = arith.constant 0 : index
    %0 = vector.load %arg1[%c0, %c0_0] : memref<16x128xf32, #tpu.memory_space<vmem>>, vector<16x128xf32>
    %c0_1 = arith.constant 0 : index
    %c0_2 = arith.constant 0 : index
    %1 = vector.load %arg2[%c0_1, %c0_2] : memref<1x128xf32, #tpu.memory_space<vmem>>, vector<1x128xf32>
    %c0_3 = arith.constant 0 : index
    %c0_4 = arith.constant 0 : index
    %2 = vector.load %arg3[%c0_3, %c0_4] : memref<1x128xf32, #tpu.memory_space<vmem>>, vector<1x128xf32>
    %cst = arith.constant dense<0.000000e+00> : vector<16xf32>
    %3 = vector.multi_reduction <add>, %0, %cst [1] : vector<16x128xf32> to vector<16xf32>
    %4 = vector.shape_cast %3 : vector<16xf32> to vector<16x1xf32>
    %cst_5 = arith.constant 1.280000e+02 : f32
    %5 = vector.broadcast %cst_5 : f32 to vector<16x1xf32>
    %6 = arith.divf %4, %5 : vector<16x1xf32>
    %7 = vector.broadcast %6 : vector<16x1xf32> to vector<16x128xf32>
    %8 = arith.subf %0, %7 : vector<16x128xf32>
    %9 = arith.mulf %8, %8 : vector<16x128xf32>
    %cst_6 = arith.constant dense<0.000000e+00> : vector<16xf32>
    %10 = vector.multi_reduction <add>, %9, %cst_6 [1] : vector<16x128xf32> to vector<16xf32>
    %11 = vector.shape_cast %10 : vector<16xf32> to vector<16x1xf32>
    %cst_7 = arith.constant 1.280000e+02 : f32
    %12 = vector.broadcast %cst_7 : f32 to vector<16x1xf32>
    %13 = arith.divf %11, %12 : vector<16x1xf32>
    %cst_8 = arith.constant 9.99999996E-13 : f32
    %14 = vector.broadcast %cst_8 : f32 to vector<16x1xf32>
    %15 = arith.addf %13, %14 : vector<16x1xf32>
    %16 = math.rsqrt %15 : vector<16x1xf32>
    %17 = vector.broadcast %16 : vector<16x1xf32> to vector<16x128xf32>
    %18 = arith.mulf %8, %17 : vector<16x128xf32>
    %19 = vector.broadcast %1 : vector<1x128xf32> to vector<16x128xf32>
    %20 = arith.mulf %18, %19 : vector<16x128xf32>
    %21 = vector.broadcast %2 : vector<1x128xf32> to vector<16x128xf32>
    %22 = arith.addf %20, %21 : vector<16x128xf32>
    %23 = arith.truncf %22 : vector<16x128xf32> to vector<16x128xbf16>
    %c0_9 = arith.constant 0 : index
    %c0_10 = arith.constant 0 : index
    %24 = vector.load %arg4[%c0_9, %c0_10] : memref<16x128xbf16, #tpu.memory_space<vmem>>, vector<16x128xbf16>
    tpu.vector_store %arg4[%c0_9, %c0_10], %23 {strides = array<i32>} : memref<16x128xbf16, #tpu.memory_space<vmem>>, vector<16x128xbf16>,
    return
  }
  func.func @transform_0(%arg0: i32) -> (i32, i32) {
    %c0_i32 = arith.constant 0 : i32
    %c0_i32_0 = arith.constant 0 : i32
    return %arg0, %c0_i32 : i32, i32
  }
  func.func @transform_1(%arg0: i32) -> (i32, i32) {
    %c0_i32 = arith.constant 0 : i32
    %c0_i32_0 = arith.constant 0 : i32
    %c0_i32_1 = arith.constant 0 : i32
    return %c0_i32, %c0_i32_0 : i32, i32
  }
  func.func @transform_2(%arg0: i32) -> (i32, i32) {
    %c0_i32 = arith.constant 0 : i32
    %c0_i32_0 = arith.constant 0 : i32
    %c0_i32_1 = arith.constant 0 : i32
    return %c0_i32, %c0_i32_0 : i32, i32
  }
  func.func @transform_3(%arg0: i32) -> (i32, i32) {
    %c0_i32 = arith.constant 0 : i32
    %c0_i32_0 = arith.constant 0 : i32
    return %arg0, %c0_i32 : i32, i32
  }
}

</mosaic_0001>

<bundles_post_ra>
// kernel: tpu_custom_call.1
= control target key start
LH: loop header
LB: loop body
LE: loop exit
PB: predicated region body
PF: predicated region fallthrough
CT: control target
= control target key end

     0   :  { %8 = vsyncpa [#allocation3], 0  ;;  %s202_s0 = inlined_call_operand.hbm [shape: f32[16,128], index: 0, kind: input, shape index: {}]   ;;  %s203_s1 = inlined_call_operand.vmem [shape: f32[1,128], index: 1, kind: input, shape index: {}]   ;;  %s204_s2 = inlined_call_operand.vmem [shape: f32[1,128], index: 2, kind: input, shape index: {}]   ;;  %s205_s3 = inlined_call_operand.hbm [shape: bf16[16,128], index: 3, kind: output, shape index: {}]  }
   0x1   :  { %9 = vsyncpa [#allocation4], 0  ;;  %s164_s12 = smov [#allocation2]  }
   0x2   :  { %s15_s13 = sshll.u32 %s164_s12, 4  ;;  %s16_s13 = int_to_ptr.vmem [resolvable:$true] %s15_s13 }
   0x3   :  { %s128_s14 = scalar_lea.vmem %s16_s13, 256  ;;  %p133_p1 = scmp.lt.s32.totalorder %s16_s13, %s16_s13 }
   0x4   :  { %p129_p0 = scmp.ne.s32.totalorder %s16_s13, %s128_s14  ;;  %p134_p2 = scmp.lt.s32.totalorder %s128_s14, %s128_s14 }
   0x6   :  { %p135_p3 = por %p134_p2, %p133_p1 }
   0x8   :  { %p136_p4 = pnand %p135_p3, %p129_p0 }
   0xa   :  { %139 = shalt.err (!%p136_p4)
}
   0xb   :  { %s165_s15 = smov 128   ;;  %s166_s16 = smov 8  }
   0xc   :  { %21 = dma.hbm_to_vmem [thread:$0]  %s202_s0, 256, %s16_s13, [#allocation3], %s165_s15, %s165_s15, %s166_s16  }
   0xd   :  { %160 = dma.done.wait [#allocation3], 256  }
   0xe   :  { %161 = vsyncadd [#allocation3], 4294967040  ;;  %v29_v0 = vld [vmem:[#allocation2] sm:$0xff]  ;;  %v30_v1 = vld [vmem:[#allocation2 + $0x8] sm:$0xff]  ;;  %s167_s22 = smov [#allocation5]  }
   0xf   :  { %33 = vadd.xlane.f32.xlu0 %v29_v0  ;;  %v99_v18 = vld [vmem:[%s203_s1] ss:$0 sm:$0xff]  ;;  %s87_s23 = sshll.u32 %s167_s22, 4  ;;  %s88_s23 = int_to_ptr.vmem [resolvable:$true] %s87_s23 }
  0x10   :  { %v100_v22 = vld [vmem:[%s204_s2] ss:$0 sm:$0xff]  ;;  %s140_s24 = scalar_lea.vmem %s88_s23, 128  ;;  %p145_p6 = scmp.lt.s32.totalorder %s88_s23, %s88_s23 }
  0x11   :  { %p141_p5 = scmp.ne.s32.totalorder %s88_s23, %s140_s24  ;;  %p146_p7 = scmp.lt.s32.totalorder %s140_s24, %s140_s24 }
  0x13   :  { %35 = vadd.xlane.f32.xlu0 %v30_v1  ;;  %p147_p8 = por %p146_p7, %p145_p6 }
  0x15   :  { %p148_p9 = pnand %p147_p8, %p141_p5 }
  0x98   :  { %v34_v2 = vpop.xlane.xlu0 %33 }
  0x99   :  { %v38_v3 = vmul.f32 0.0078125, %v34_v2 }
  0x9b   :  { %v40_v4 = vsub.f32 %v29_v0, %v38_v3 }
  0x9c   :  { %v36_v5 = vpop.xlane.xlu0 %35 }
  0x9d   :  { %v39_v6 = vmul.f32 0.0078125, %v36_v5  ;;  %v42_v7 = vmul.f32 %v40_v4, %v40_v4 }
  0x9f   :  { %v41_v8 = vsub.f32 %v30_v1, %v39_v6  ;;  %44 = vadd.xlane.f32.xlu1 %v42_v7 }
  0xa1   :  { %v43_v9 = vmul.f32 %v41_v8, %v41_v8 }
  0xa3   :  { %46 = vadd.xlane.f32.xlu1 %v43_v9 }
 0x128   :  { %v45_v10 = vpop.xlane.xlu1 %44 }
 0x129   :  { %v48_v11 = vmul.f32 0.0078125, %v45_v10 }
 0x12b   :  { %v50_v12 = vadd.f32 1e-12, %v48_v11 }
 0x12c   :  { %v47_v13 = vpop.xlane.xlu1 %46 }
 0x12d   :  { %116 = vrsqrt.f32 %v50_v12  ;;  %v49_v14 = vmul.f32 0.0078125, %v47_v13 }
 0x12f   :  { %v51_v15 = vadd.f32 1e-12, %v49_v14 }
 0x131   :  { %118 = vrsqrt.f32 %v51_v15 }
 0x13a   :  { %v117_v16 = vpop.eup %116 }
 0x13b   :  { %v54_v17 = vmul.f32 %v117_v16, %v40_v4 }
 0x13d   :  { %v62_v21 = vmul.f32 %v99_v18, %v54_v17 }
 0x13e   :  { %v119_v19 = vpop.eup %118 }
 0x13f   :  { %v55_v20 = vmul.f32 %v119_v19, %v41_v8  ;;  %v70_v24 = vadd.f32 %v100_v22, %v62_v21 }
 0x141   :  { %v63_v23 = vmul.f32 %v99_v18, %v55_v20 }
 0x143   :  { %v71_v25 = vadd.f32 %v100_v22, %v63_v23 }
 0x145   :  { %v108_v26 = vpack.c.bf16 %v71_v25, %v70_v24 }
 0x147   :  { %109 = vst [vmem:[#allocation5] sm:$0xff] %v108_v26  }
 0x148   :  { %151 = shalt.err (!%p148_p9)
}
 0x149   :  { %s168_s1 = smov 64   ;;  %s169_s25 = smov 4  }
 0x14a   :  { %93 = dma.vmem_to_hbm [thread:$0]  %s88_s23, 128, %s205_s3, [#allocation4], %s168_s1, %s168_s1, %s169_s25  }
 0x14b   :  { %162 = dma.done.wait [#allocation4], 128  }
 0x14c   :  { %163 = vsyncadd [#allocation4], 4294967168 }
 0x14d   :  { %97 = vsyncpa [#allocation3], 1 }
 0x14e   :  { %98 = vsyncpa [#allocation4], 1 }

</bundles_post_ra>
